<compile_context>
chip_gen: v6e
topology: v6e:2x2x1
jax: 0.10.0
libtpu: 0.0.40
codegen_flags: <defaults>
</compile_context>

<pallas_src>
from functools import partial

import jax
import jax.numpy as jnp
from jax.experimental import pallas as pl
from jax.experimental.pallas import tpu as pltpu

_BN_EPS = 1e-5
_BN_SHIFT = 1e-4          # GCNMasker.__init__: all BatchNorm1d weights=1, biases=1e-4
_FPAD = 128               # lane-dense padded feature width (H=32, 2H=64, Din=16 all <=128)


def _round_up(v, m):
    return (v + m - 1) // m * m


# ---------------------------------------------------------------------------
# Fused kernel: all GIN layers + (folded-in) masker attention head in one launch
# ---------------------------------------------------------------------------
def _fused_forward_kernel(num_layer,
                          x_ref, a_ref,
                          w1_ref, b1_ref, w2_ref, b2_ref,
                          out_ref):
    a = a_ref[...]                     # (Np, Np) dense adjacency A[dst, src]
    h = x_ref[...]                     # (Np, 128) padded node features
    for li in range(num_layer):        # static unroll; h stays VMEM-resident across layers
        # message passing: sum of source-node features into each destination node (MXU)
        agg = jnp.dot(a, h, preferred_element_type=jnp.float32)
        z = h + agg                    # (1 + eps) * x + agg, eps = 0
        # GIN mlp with BN(2H)/BN(H) folded into the linears at trace time
        t = jnp.dot(z, w1_ref[li], preferred_element_type=jnp.float32) + b1_ref[li]
        t = jnp.maximum(t, 0.0)        # ReLU inside the GIN mlp
        t = jnp.dot(t, w2_ref[li], preferred_element_type=jnp.float32) + b2_ref[li]
        if li != num_layer - 1:        # encoder ReLU after every layer except the last
            t = jnp.maximum(t, 0.0)
        h = t                          # Dropout is identity in eval mode
    # last-layer w2 has the attention head folded in, so `h` already holds:
    #   col 0 = node logit diff (+ node bias diff)
    #   col 1 = edge row-node contribution (+ edge bias diff)
    #   col 2 = edge col-node contribution
    out_ref[...] = h                   # lane-dense (Np, 128) store


# ---------------------------------------------------------------------------
# Trace-time parameter folding / padding (BN fold + softmax->sigmoid + head fusion)
# ---------------------------------------------------------------------------
def _fold_and_pad_params(layer_params, head_params, din, hidden):
    bn_scale = 1.0 / jnp.sqrt(1.0 + _BN_EPS)   # eval BN with default running stats
    num_layer = len(layer_params)

    # softmax over 2 classes -> sigmoid(logit1 - logit0): fuse the two weight columns
    dwn = head_params["wn"][:, 1] - head_params["wn"][:, 0]
    dwer = head_params["we_row"][:, 1] - head_params["we_row"][:, 0]
    dwec = head_params["we_col"][:, 1] - head_params["we_col"][:, 0]
    wh = jnp.zeros((_FPAD, _FPAD), jnp.float32)
    wh = wh.at[:hidden, 0].set(dwn).at[:hidden, 1].set(dwer).at[:hidden, 2].set(dwec)
    bn_d = head_params["bn"][0, 1] - head_params["bn"][0, 0]
    be_d = head_params["be"][0, 1] - head_params["be"][0, 0]

    w1s, b1s, w2s, b2s = [], [], [], []
    for li, p in enumerate(layer_params):
        d_in = din if li == 0 else hidden
        # fold BN: (x@w + b)*s + t  ==  x@(w*s) + (b*s + t)
        w1 = p["w1"] * bn_scale
        b1 = p["b1"] * bn_scale + _BN_SHIFT
        w2 = p["w2"] * bn_scale
        b2 = p["b2"] * bn_scale + _BN_SHIFT
        w1_pad = jnp.zeros((_FPAD, _FPAD), jnp.float32).at[:d_in, :2 * hidden].set(w1)
        b1_pad = jnp.zeros((1, _FPAD), jnp.float32).at[:, :2 * hidden].set(b1)
        w2_pad = jnp.zeros((_FPAD, _FPAD), jnp.float32).at[:2 * hidden, :hidden].set(w2)
        b2_pad = jnp.zeros((1, _FPAD), jnp.float32).at[:, :hidden].set(b2)
        if li == num_layer - 1:
            # fold the attention head into the last layer's second linear:
            #   h @ Wh + bias  ==  relu_out @ (w2' @ Wh) + (b2' @ Wh + bias)
            w2_pad = w2_pad @ wh
            b2_pad = (b2_pad @ wh).at[0, 0].add(bn_d).at[0, 1].add(be_d)
        w1s.append(w1_pad)
        b1s.append(b1_pad)
        w2s.append(w2_pad)
        b2s.append(b2_pad)
    return jnp.stack(w1s), jnp.stack(b1s), jnp.stack(w2s), jnp.stack(b2s)


# ---------------------------------------------------------------------------
# GCNMasker forward: one fused Pallas kernel + O(N)/O(E) glue for gather/sigmoid
# ---------------------------------------------------------------------------
def gcn_masker_forward(x, edge_index, layer_params, head_params):
    n, din = x.shape
    hidden = layer_params[-1]["w2"].shape[1]
    num_layer = len(layer_params)
    row, col = edge_index[0], edge_index[1]

    n_pad = max(_round_up(n, 8), 8)

    # glue: dense adjacency A[dst, src]; duplicate edges accumulate. No implicit
    # self-loops — the explicit (1+eps)*x term supplies the self contribution (as in PyG).
    a = jnp.zeros((n_pad, n_pad), jnp.float32).at[col, row].add(1.0)
    x_pad = jnp.zeros((n_pad, _FPAD), jnp.float32).at[:n, :din].set(x)

    w1_all, b1_all, w2_all, b2_all = _fold_and_pad_params(
        layer_params, head_params, din, hidden)

    vmem = pl.BlockSpec(memory_space=pltpu.MemorySpace.VMEM)
    head_out = pl.pallas_call(
        partial(_fused_forward_kernel, num_layer),
        out_shape=jax.ShapeDtypeStruct((n_pad, _FPAD), jnp.float32),
        in_specs=[vmem] * 6,
        out_specs=vmem,
        compiler_params=pltpu.CompilerParams(vmem_limit_bytes=48 * 1024 * 1024),
    )(x_pad, a, w1_all, b1_all, w2_all, b2_all)

    # glue: data-dependent gather of (N,)-sized columns + sigmoid on 1-D vectors
    # (left in XLA: it is O(N)+O(E) scalar work, no (E,H) tensors touch HBM anymore).
    node_weight_o = jax.nn.sigmoid(head_out[:n, 0])
    edge_weight_o = jax.nn.sigmoid(head_out[row, 1] + head_out[col, 2])
    return edge_weight_o, node_weight_o


# ---------------------------------------------------------------------------
# Pure-JAX reference (faithful PyTorch eval-mode semantics) for validation
# ---------------------------------------------------------------------------
def reference_forward(x, edge_index, layer_params, head_params):
    n = x.shape[0]
    row, col = edge_index[0], edge_index[1]
    bn_scale = 1.0 / jnp.sqrt(1.0 + _BN_EPS)
    h = x
    num_layers = len(layer_params)
    for li, p in enumerate(layer_params):
        agg = jax.ops.segment_sum(h[row], col, num_segments=n)
        z = h + agg
        t = z @ p["w1"] + p["b1"]
        t = t * bn_scale + _BN_SHIFT
        t = jnp.maximum(t, 0.0)
        t = t @ p["w2"] + p["b2"]
        t = t * bn_scale + _BN_SHIFT
        if li != num_layers - 1:
            t = jnp.maximum(t, 0.0)
        h = t
    node_logits = h @ head_params["wn"] + head_params["bn"]
    edge_logits = (h[row] @ head_params["we_row"] + h[col] @ head_params["we_col"]
                   + head_params["be"])
    node_att = jax.nn.softmax(node_logits, axis=-1)
    edge_att = jax.nn.softmax(edge_logits, axis=-1)
    return edge_att[:, 1], node_att[:, 1]


# ---------------------------------------------------------------------------
# Deterministic parameter construction (PyTorch-layout params; folding is done later)
# ---------------------------------------------------------------------------
def make_params(key, hidden_in, hidden, num_layer):
    layer_params = []
    for li in range(num_layer):
        din = hidden_in if li == 0 else hidden
        key, k1, k2 = jax.random.split(key, 3)
        w1 = jax.random.normal(k1, (din, 2 * hidden), jnp.float32) * 0.1
        w2 = jax.random.normal(k2, (2 * hidden, hidden), jnp.float32) * 0.1
        layer_params.append(dict(
            w1=w1, b1=jnp.zeros((1, 2 * hidden), jnp.float32),
            w2=w2, b2=jnp.zeros((1, hidden), jnp.float32),
        ))
    key, kn, ke = jax.random.split(key, 3)
    we = jax.random.normal(ke, (2 * hidden, 2), jnp.float32) * 0.1   # edge_att_mlp
    wn = jax.random.normal(kn, (hidden, 2), jnp.float32) * 0.1       # node_att_mlp
    head_params = dict(
        wn=wn, bn=jnp.zeros((1, 2), jnp.float32),
        we_row=we[:hidden], we_col=we[hidden:], be=jnp.zeros((1, 2), jnp.float32),
    )
    # TODO(synk): bnc / bno BatchNorms exist in GCNMasker.__init__ but are unused in forward.
    return layer_params, head_params


if __name__ == "__main__":
    HIDDEN_IN = 16   # != 39 and mol=False -> GINEncoder backbone
    HIDDEN = 32
    NUM_LAYER = 2
    N_NODES = 64
    N_EDGES = 128

    key = jax.random.PRNGKey(0)
    key, kx, ke = jax.random.split(key, 3)
    x = jax.random.normal(kx, (N_NODES, HIDDEN_IN), jnp.float32)
    edge_index = jax.random.randint(ke, (2, N_EDGES), 0, N_NODES, dtype=jnp.int32)

    layer_params, head_params = make_params(key, HIDDEN_IN, HIDDEN, NUM_LAYER)

    fwd = jax.jit(gcn_masker_forward)
    edge_w, node_w = fwd(x, edge_index, layer_params, head_params)
    edge_w = jax.block_until_ready(edge_w)
    node_w = jax.block_until_ready(node_w)

    edge_w_ref, node_w_ref = reference_forward(x, edge_index, layer_params, head_params)
    assert edge_w.shape == (N_EDGES,) and node_w.shape == (N_NODES,)
    assert jnp.allclose(edge_w, edge_w_ref, rtol=1e-5, atol=1e-5)
    assert jnp.allclose(node_w, node_w_ref, rtol=1e-5, atol=1e-5)

    print("KERNEL_OK")
</pallas_src>

<mosaic_0001>
module attributes {stable_mosaic.version = 11 : i64} {
  func.func private @main(%arg0: i32) attributes {dimension_semantics = [#tpu.dimension_semantics<core_parallel>], iteration_bounds = array<i64: 2>, tpu.core_type = #tpu.core_type<sc_scalar_subcore>, window_params = []} {
    return
  }
}

module attributes {stable_mosaic.version = 11 : i64} {
  func.func private @main(%arg0: i32) attributes {dimension_semantics = [#tpu.dimension_semantics<core_parallel>], iteration_bounds = array<i64: 2>, tpu.core_type = #tpu.core_type<sc_scalar_subcore>, window_params = []} {
    return
  }
}

module attributes {stable_mosaic.version = 11 : i64} {
  func.func @_fused_forward_kernel(%arg0: memref<64x128xf32, #tpu.memory_space<vmem>>, %arg1: memref<64x64xf32, #tpu.memory_space<vmem>>, %arg2: memref<2x128x128xf32, #tpu.memory_space<vmem>>, %arg3: memref<2x1x128xf32, #tpu.memory_space<vmem>>, %arg4: memref<2x128x128xf32, #tpu.memory_space<vmem>>, %arg5: memref<2x1x128xf32, #tpu.memory_space<vmem>>, %arg6: memref<64x128xf32, #tpu.memory_space<vmem>>) attributes {dimension_semantics = [], scalar_prefetch = 0 : i64, scratch_operands = 0 : i64, tpu.core_type = #tpu.core_type<tc>} {
    %c0 = arith.constant 0 : index
    %c0_0 = arith.constant 0 : index
    %0 = vector.load %arg1[%c0, %c0_0] : memref<64x64xf32, #tpu.memory_space<vmem>>, vector<64x64xf32>
    %c0_1 = arith.constant 0 : index
    %c0_2 = arith.constant 0 : index
    %1 = vector.load %arg0[%c0_1, %c0_2] : memref<64x128xf32, #tpu.memory_space<vmem>>, vector<64x128xf32>
    %cst = arith.constant dense<0.000000e+00> : vector<64x128xf32>
    %2 = tpu.matmul %0, %1, %cst {dimension_numbers = #tpu.dot_dimension_numbers<[1], [0], [0], [1], [0, 0, 1, 1], [], []>} : vector<64x64xf32>, vector<64x128xf32>, vector<64x128xf32> -> vector<64x128xf32>
    %3 = arith.addf %1, %2 : vector<64x128xf32>
    %c0_3 = arith.constant 0 : index
    %c0_4 = arith.constant 0 : index
    %c0_5 = arith.constant 0 : index
    %4 = vector.load %arg2[%c0_3, %c0_4, %c0_5] : memref<2x128x128xf32, #tpu.memory_space<vmem>>, vector<1x128x128xf32>
    %5 = vector.shape_cast %4 : vector<1x128x128xf32> to vector<128x128xf32>
    %cst_6 = arith.constant dense<0.000000e+00> : vector<64x128xf32>
    %6 = tpu.matmul %3, %5, %cst_6 {dimension_numbers = #tpu.dot_dimension_numbers<[1], [0], [0], [1], [0, 0, 1, 1], [], []>} : vector<64x128xf32>, vector<128x128xf32>, vector<64x128xf32> -> vector<64x128xf32>
    %c0_7 = arith.constant 0 : index
    %c0_8 = arith.constant 0 : index
    %c0_9 = arith.constant 0 : index
    %7 = vector.load %arg3[%c0_7, %c0_8, %c0_9] : memref<2x1x128xf32, #tpu.memory_space<vmem>>, vector<1x1x128xf32>
    %8 = vector.shape_cast %7 : vector<1x1x128xf32> to vector<1x128xf32>
    %9 = vector.broadcast %8 : vector<1x128xf32> to vector<64x128xf32>
    %10 = arith.addf %6, %9 : vector<64x128xf32>
    %cst_10 = arith.constant 0.000000e+00 : f32
    %11 = vector.broadcast %cst_10 : f32 to vector<64x128xf32>
    %12 = arith.maximumf %10, %11 : vector<64x128xf32>
    %c0_11 = arith.constant 0 : index
    %c0_12 = arith.constant 0 : index
    %c0_13 = arith.constant 0 : index
    %13 = vector.load %arg4[%c0_11, %c0_12, %c0_13] : memref<2x128x128xf32, #tpu.memory_space<vmem>>, vector<1x128x128xf32>
    %14 = vector.shape_cast %13 : vector<1x128x128xf32> to vector<128x128xf32>
    %cst_14 = arith.constant dense<0.000000e+00> : vector<64x128xf32>
    %15 = tpu.matmul %12, %14, %cst_14 {dimension_numbers = #tpu.dot_dimension_numbers<[1], [0], [0], [1], [0, 0, 1, 1], [], []>} : vector<64x128xf32>, vector<128x128xf32>, vector<64x128xf32> -> vector<64x128xf32>
    %c0_15 = arith.constant 0 : index
    %c0_16 = arith.constant 0 : index
    %c0_17 = arith.constant 0 : index
    %16 = vector.load %arg5[%c0_15, %c0_16, %c0_17] : memref<2x1x128xf32, #tpu.memory_space<vmem>>, vector<1x1x128xf32>
    %17 = vector.shape_cast %16 : vector<1x1x128xf32> to vector<1x128xf32>
    %18 = vector.broadcast %17 : vector<1x128xf32> to vector<64x128xf32>
    %19 = arith.addf %15, %18 : vector<64x128xf32>
    %cst_18 = arith.constant 0.000000e+00 : f32
    %20 = vector.broadcast %cst_18 : f32 to vector<64x128xf32>
    %21 = arith.maximumf %19, %20 : vector<64x128xf32>
    %cst_19 = arith.constant dense<0.000000e+00> : vector<64x128xf32>
    %22 = tpu.matmul %0, %21, %cst_19 {dimension_numbers = #tpu.dot_dimension_numbers<[1], [0], [0], [1], [0, 0, 1, 1], [], []>} : vector<64x64xf32>, vector<64x128xf32>, vector<64x128xf32> -> vector<64x128xf32>
    %23 = arith.addf %21, %22 : vector<64x128xf32>
    %c1 = arith.constant 1 : index
    %c0_20 = arith.constant 0 : index
    %c0_21 = arith.constant 0 : index
    %24 = vector.load %arg2[%c1, %c0_20, %c0_21] : memref<2x128x128xf32, #tpu.memory_space<vmem>>, vector<1x128x128xf32>
    %25 = vector.shape_cast %24 : vector<1x128x128xf32> to vector<128x128xf32>
    %cst_22 = arith.constant dense<0.000000e+00> : vector<64x128xf32>
    %26 = tpu.matmul %23, %25, %cst_22 {dimension_numbers = #tpu.dot_dimension_numbers<[1], [0], [0], [1], [0, 0, 1, 1], [], []>} : vector<64x128xf32>, vector<128x128xf32>, vector<64x128xf32> -> vector<64x128xf32>
    %c1_23 = arith.constant 1 : index
    %c0_24 = arith.constant 0 : index
    %c0_25 = arith.constant 0 : index
    %27 = vector.load %arg3[%c1_23, %c0_24, %c0_25] : memref<2x1x128xf32, #tpu.memory_space<vmem>>, vector<1x1x128xf32>
    %28 = vector.shape_cast %27 : vector<1x1x128xf32> to vector<1x128xf32>
    %29 = vector.broadcast %28 : vector<1x128xf32> to vector<64x128xf32>
    %30 = arith.addf %26, %29 : vector<64x128xf32>
    %cst_26 = arith.constant 0.000000e+00 : f32
    %31 = vector.broadcast %cst_26 : f32 to vector<64x128xf32>
    %32 = arith.maximumf %30, %31 : vector<64x128xf32>
    %c1_27 = arith.constant 1 : index
    %c0_28 = arith.constant 0 : index
    %c0_29 = arith.constant 0 : index
    %33 = vector.load %arg4[%c1_27, %c0_28, %c0_29] : memref<2x128x128xf32, #tpu.memory_space<vmem>>, vector<1x128x128xf32>
    %34 = vector.shape_cast %33 : vector<1x128x128xf32> to vector<128x128xf32>
    %cst_30 = arith.constant dense<0.000000e+00> : vector<64x128xf32>
    %35 = tpu.matmul %32, %34, %cst_30 {dimension_numbers = #tpu.dot_dimension_numbers<[1], [0], [0], [1], [0, 0, 1, 1], [], []>} : vector<64x128xf32>, vector<128x128xf32>, vector<64x128xf32> -> vector<64x128xf32>
    %c1_31 = arith.constant 1 : index
    %c0_32 = arith.constant 0 : index
    %c0_33 = arith.constant 0 : index
    %36 = vector.load %arg5[%c1_31, %c0_32, %c0_33] : memref<2x1x128xf32, #tpu.memory_space<vmem>>, vector<1x1x128xf32>
    %37 = vector.shape_cast %36 : vector<1x1x128xf32> to vector<1x128xf32>
    %38 = vector.broadcast %37 : vector<1x128xf32> to vector<64x128xf32>
    %39 = arith.addf %35, %38 : vector<64x128xf32>
    %c0_34 = arith.constant 0 : index
    %c0_35 = arith.constant 0 : index
    %40 = vector.load %arg6[%c0_34, %c0_35] : memref<64x128xf32, #tpu.memory_space<vmem>>, vector<64x128xf32>
    tpu.vector_store %arg6[%c0_34, %c0_35], %39 {strides = array<i32>} : memref<64x128xf32, #tpu.memory_space<vmem>>, vector<64x128xf32>,
    return
  }
}

</mosaic_0001>

<bundles_post_ra>
// kernel: gcn_masker_forward.1
= control target key start
LH: loop header
LB: loop body
LE: loop exit
PB: predicated region body
PF: predicated region fallthrough
CT: control target
= control target key end

     0   :  { %11 = vsyncpa [#allocation3], 0  ;;  %s1296_s21 = smov [#allocation2]   ;;  %s1712_s0 = inlined_call_operand.vmem [shape: f32[64,128], index: 0, kind: input, shape index: {}]   ;;  %s1713_s1 = inlined_call_operand.hbm [shape: f32[64,64], index: 1, kind: input, shape index: {}]   ;;  %s1714_s2 = inlined_call_operand.vmem [shape: f32[2,128,128], index: 2, kind: input, shape index: {}]   ;;  %s1715_s3 = inlined_call_operand.vmem [shape: f32[2,1,128], index: 3, kind: input, shape index: {}]   ;;  %s1716_s4 = inlined_call_operand.vmem [shape: f32[2,128,128], index: 4, kind: input, shape index: {}]   ;;  %s1717_s5 = inlined_call_operand.vmem [shape: f32[2,1,128], index: 5, kind: input, shape index: {}]   ;;  %s1718_s6 = inlined_call_operand.vmem [shape: f32[64,128], index: 6, kind: output, shape index: {}]  }
   0x1   :  { %s19_s22 = sshll.u32 %s1296_s21, 4  ;;  %s20_s22 = int_to_ptr.vmem [resolvable:$true] %s19_s22 }
   0x2   :  { %s1282_s23 = scalar_lea.vmem %s20_s22, 1024  ;;  %p1287_p1 = scmp.lt.s32.totalorder %s20_s22, %s20_s22 }
   0x3   :  { %p1283_p0 = scmp.ne.s32.totalorder %s20_s22, %s1282_s23  ;;  %p1288_p2 = scmp.lt.s32.totalorder %s1282_s23, %s1282_s23 }
   0x5   :  { %p1289_p3 = por %p1288_p2, %p1287_p1 }
   0x7   :  { %p1290_p4 = pnand %p1289_p3, %p1283_p0 }
   0x9   :  { %1293 = shalt.err (!%p1290_p4)
}
   0xa   :  { %s1297_s24 = smov 128   ;;  %s1298_s25 = smov 8  }
   0xb   :  { %25 = dma.hbm_to_vmem [thread:$0]  %s1713_s1, 1024, %s20_s22, [#allocation3], %s1297_s24, %s1297_s24, %s1298_s25  }
   0xc   :  { %1294 = dma.done.wait [#allocation3], 1024  }
   0xd   :  { %1295 = vsyncadd [#allocation3], 4294966272  ;;  %v1340_v0 = vld [vmem:[%s1712_s0 + $0x38] sm:$0xff]  ;;  %v1345_v1 = vld [vmem:[%s1712_s0 + $0x30] sm:$0xff]  ;;  %vm53_vm0 = vcmask 523264  }
   0xe   :  { %1039 = vmatprep.subr.mxu0 %v1340_v0  ;;  %v1352_v2 = vld [vmem:[%s1712_s0 + $0x28] sm:$0xff]  ;;  %v1354_v3 = vld [vmem:[#allocation2] sm:$0xff]  ;;  %v206_v5 = vld [vmem:[%s1714_s2 + $0x78] sm:$0xff] }
   0xf   :  { %1040 = vmatpush3.msra.mxu0 %v1340_v0  ;;  %1055 = vmatprep.mubr.msk.f32.mxu0 %vm53_vm0, %v1354_v3  ;;  %v1363_v4 = vld [vmem:[%s1712_s0 + $0x20] sm:$0xff]  ;;  %v205_v6 = vld [vmem:[%s1714_s2 + $0x70] sm:$0xff]  ;;  %v1376_v7 = vld [vmem:[%s1712_s0 + $0x18] sm:$0xff] }
  0x10   :  { %1041 = vmatprep.subr.mxu0 %v1345_v1  ;;  %1067 = vmatprep.subr.mxu1 %v206_v5  ;;  %v204_v8 = vld [vmem:[%s1714_s2 + $0x68] sm:$0xff]  ;;  %v1386_v9 = vld [vmem:[%s1712_s0 + $0x10] sm:$0xff]  ;;  %v203_v10 = vld [vmem:[%s1714_s2 + $0x60] sm:$0xff] }
  0x11   :  { %1042 = vmatpush3.msra.mxu0 %v1345_v1  ;;  %1068 = vmatpush3.msra.mxu1 %v206_v5  ;;  %v1396_v11 = vld [vmem:[%s1712_s0 + $0x8] sm:$0xff]  ;;  %v202_v12 = vld [vmem:[%s1714_s2 + $0x58] sm:$0xff]  ;;  %v1406_v13 = vld [vmem:[%s1712_s0] sm:$0xff] }
  0x12   :  { %1043 = vmatprep.subr.mxu0 %v1352_v2  ;;  %1069 = vmatprep.subr.mxu1 %v205_v6  ;;  %v201_v14 = vld [vmem:[%s1714_s2 + $0x50] sm:$0xff]  ;;  %v1413_v15 = vld [vmem:[#allocation2 + $0x8] sm:$0xff]  ;;  %v199_v18 = vld [vmem:[%s1714_s2 + $0x40] sm:$0xff] }
  0x13   :  { %1044 = vmatpush3.msra.mxu0 %v1352_v2  ;;  %1070 = vmatpush3.msra.mxu1 %v205_v6  ;;  %v1416_v16 = vld [vmem:[#allocation2 + $0x10] sm:$0xff]  ;;  %v200_v17 = vld [vmem:[%s1714_s2 + $0x48] sm:$0xff]  ;;  %v1429_v19 = vld [vmem:[#allocation2 + $0x18] sm:$0xff] }
  0x14   :  { %1045 = vmatprep.subr.mxu0 %v1363_v4  ;;  %1071 = vmatprep.subr.mxu1 %v204_v8  ;;  %v1431_v20 = vld [vmem:[#allocation2 + $0x20] sm:$0xff]  ;;  %v198_v21 = vld [vmem:[%s1714_s2 + $0x38] sm:$0xff]  ;;  %v197_v22 = vld [vmem:[%s1714_s2 + $0x30] sm:$0xff] }
  0x15   :  { %1046 = vmatpush3.msra.mxu0 %v1363_v4  ;;  %1072 = vmatpush3.msra.mxu1 %v204_v8  ;;  %v1443_v23 = vld [vmem:[#allocation2 + $0x28] sm:$0xff]  ;;  %v1445_v24 = vld [vmem:[#allocation2 + $0x30] sm:$0xff]  ;;  %v195_v26 = vld [vmem:[%s1714_s2 + $0x20] sm:$0xff] }
  0x16   :  { %1047 = vmatprep.subr.mxu0 %v1376_v7  ;;  %1073 = vmatprep.subr.mxu1 %v203_v10  ;;  %v196_v25 = vld [vmem:[%s1714_s2 + $0x28] sm:$0xff]  ;;  %v1457_v27 = vld [vmem:[#allocation2 + $0x38] sm:$0xff]  ;;  %v193_v29 = vld [vmem:[%s1714_s2 + $0x10] sm:$0xff] }
  0x17   :  { %1048 = vmatpush3.msra.mxu0 %v1376_v7  ;;  %1074 = vmatpush3.msra.mxu1 %v203_v10  ;;  %v194_v28 = vld [vmem:[%s1714_s2 + $0x18] sm:$0xff]  ;;  %v192_v30 = vld [vmem:[%s1714_s2 + $0x8] sm:$0xff]  ;;  %v191_v31 = vld [vmem:[%s1714_s2] sm:$0xff] }
  0x18   :  { %1049 = vmatprep.subr.mxu0 %v1386_v9  ;;  %1075 = vmatprep.subr.mxu1 %v202_v12  ;;  %v342_v32 = vld [vmem:[%s1716_s4 + $0x78] sm:$0xff]  ;;  %v341_v33 = vld [vmem:[%s1716_s4 + $0x70] sm:$0xff]  ;;  %v340_v34 = vld [vmem:[%s1716_s4 + $0x68] sm:$0xff] }
  0x19   :  { %1050 = vmatpush3.msra.mxu0 %v1386_v9  ;;  %1076 = vmatpush3.msra.mxu1 %v202_v12  ;;  %v339_v35 = vld [vmem:[%s1716_s4 + $0x60] sm:$0xff]  ;;  %v338_v36 = vld [vmem:[%s1716_s4 + $0x58] sm:$0xff]  ;;  %v337_v37 = vld [vmem:[%s1716_s4 + $0x50] sm:$0xff] }
  0x1a   :  { %1051 = vmatprep.subr.mxu0 %v1396_v11  ;;  %1077 = vmatprep.subr.mxu1 %v201_v14  ;;  %v336_v38 = vld [vmem:[%s1716_s4 + $0x48] sm:$0xff]  ;;  %v335_v39 = vld [vmem:[%s1716_s4 + $0x40] sm:$0xff]  ;;  %v334_v40 = vld [vmem:[%s1716_s4 + $0x38] sm:$0xff] }
  0x1b   :  { %1052 = vmatpush3.msra.mxu0 %v1396_v11  ;;  %1078 = vmatpush3.msra.mxu1 %v201_v14  ;;  %v333_v41 = vld [vmem:[%s1716_s4 + $0x30] sm:$0xff]  ;;  %v332_v42 = vld [vmem:[%s1716_s4 + $0x28] sm:$0xff]  ;;  %v331_v43 = vld [vmem:[%s1716_s4 + $0x20] sm:$0xff] }
  0x1c   :  { %1053 = vmatprep.subr.mxu0 %v1406_v13  ;;  %1079 = vmatprep.subr.mxu1 %v200_v17  ;;  %v330_v60 = vld [vmem:[%s1716_s4 + $0x18] sm:$0xff]  ;;  %v329_v61 = vld [vmem:[%s1716_s4 + $0x10] sm:$0xff]  ;;  %v328_v62 = vld [vmem:[%s1716_s4 + $0x8] sm:$0xff] }
  0x1d   :  { %1054 = vmatpush3.msra.mxu0 %v1406_v13  ;;  %1080 = vmatpush3.msra.mxu1 %v200_v17  ;;  %v327_v63 = vld [vmem:[%s1716_s4] sm:$0xff] }
  0x1e   :  { %1056 = vmatmul.mubr.msk.f32.vlgmr.msra.gmra.mxu0 %vm53_vm0, %v1413_v15  ;;  %1081 = vmatprep.subr.mxu1 %v199_v18 }
  0x1f   :  { %1058 = vmatprep.mubr.msk.f32.mxu0 %vm53_vm0, %v1416_v16  ;;  %1082 = vmatpush3.msra.mxu1 %v199_v18 }
  0x20   :  { %1083 = vmatprep.subr.mxu1 %v198_v21  ;;  %1111 = vmatprep.subr.mxu0 %v342_v32 }
  0x21   :  { %1084 = vmatpush3.msra.mxu1 %v198_v21  ;;  %1112 = vmatpush3.msra.mxu0 %v342_v32  ;;  %v890_v32 = vld [vmem:[%s1714_s2 + $0xf8] sm:$0xff] }
  0x22   :  { %1059 = vmatmul.mubr.msk.f32.gmra.mxu0 %vm53_vm0, %v1429_v19  ;;  %1085 = vmatprep.subr.mxu1 %v197_v22 }
  0x23   :  { %1061 = vmatprep.mubr.msk.f32.mxu0 %vm53_vm0, %v1431_v20  ;;  %1086 = vmatpush3.msra.mxu1 %v197_v22 }
  0x24   :  { %1087 = vmatprep.subr.mxu1 %v196_v25  ;;  %1113 = vmatprep.subr.mxu0 %v341_v33 }
  0x25   :  { %1088 = vmatpush3.msra.mxu1 %v196_v25  ;;  %1114 = vmatpush3.msra.mxu0 %v341_v33  ;;  %v889_v33 = vld [vmem:[%s1714_s2 + $0xf0] sm:$0xff] }
  0x26   :  { %1062 = vmatmul.mubr.msk.f32.gmra.mxu0 %vm53_vm0, %v1443_v23  ;;  %1089 = vmatprep.subr.mxu1 %v195_v26 }
  0x27   :  { %1064 = vmatprep.mubr.msk.f32.mxu0 %vm53_vm0, %v1445_v24  ;;  %1090 = vmatpush3.msra.mxu1 %v195_v26 }
  0x28   :  { %1091 = vmatprep.subr.mxu1 %v194_v28  ;;  %1115 = vmatprep.subr.mxu0 %v340_v34 }
  0x29   :  { %1092 = vmatpush3.msra.mxu1 %v194_v28  ;;  %1116 = vmatpush3.msra.mxu0 %v340_v34  ;;  %v888_v34 = vld [vmem:[%s1714_s2 + $0xe8] sm:$0xff] }
  0x2a   :  { %1065 = vmatmul.mubr.msk.f32.gmra.mxu0 %vm53_vm0, %v1457_v27  ;;  %1093 = vmatprep.subr.mxu1 %v193_v29 }
  0x2b   :  { %1094 = vmatpush3.msra.mxu1 %v193_v29  ;;  %1117 = vmatprep.subr.mxu0 %v339_v35 }
  0x2c   :  { %1095 = vmatprep.subr.mxu1 %v192_v30  ;;  %1118 = vmatpush3.msra.mxu0 %v339_v35  ;;  %v887_v35 = vld [vmem:[%s1714_s2 + $0xe0] sm:$0xff] }
  0x2d   :  { %1096 = vmatpush3.msra.mxu1 %v192_v30  ;;  %1119 = vmatprep.subr.mxu0 %v338_v36 }
  0x2e   :  { %1097 = vmatprep.subr.mxu1 %v191_v31  ;;  %1120 = vmatpush3.msra.mxu0 %v338_v36  ;;  %v886_v36 = vld [vmem:[%s1714_s2 + $0xd8] sm:$0xff] }
  0x2f   :  { %1098 = vmatpush3.msra.mxu1 %v191_v31  ;;  %1121 = vmatprep.subr.mxu0 %v337_v37 }
  0x30   :  { %1122 = vmatpush3.msra.mxu0 %v337_v37  ;;  %v885_v37 = vld [vmem:[%s1714_s2 + $0xd0] sm:$0xff] }
  0x31   :  { %1123 = vmatprep.subr.mxu0 %v336_v38 }
  0x32   :  { %1124 = vmatpush3.msra.mxu0 %v336_v38  ;;  %v884_v38 = vld [vmem:[%s1714_s2 + $0xc8] sm:$0xff] }
  0x33   :  { %1125 = vmatprep.subr.mxu0 %v335_v39 }
  0x34   :  { %1126 = vmatpush3.msra.mxu0 %v335_v39  ;;  %v883_v39 = vld [vmem:[%s1714_s2 + $0xc0] sm:$0xff] }
  0x35   :  { %1127 = vmatprep.subr.mxu0 %v334_v40 }
  0x36   :  { %1128 = vmatpush3.msra.mxu0 %v334_v40  ;;  %v882_v40 = vld [vmem:[%s1714_s2 + $0xb8] sm:$0xff] }
  0x37   :  { %1129 = vmatprep.subr.mxu0 %v333_v41 }
  0x38   :  { %1130 = vmatpush3.msra.mxu0 %v333_v41  ;;  %v881_v41 = vld [vmem:[%s1714_s2 + $0xb0] sm:$0xff] }
  0x39   :  { %1131 = vmatprep.subr.mxu0 %v332_v42 }
  0x3a   :  { %1132 = vmatpush3.msra.mxu0 %v332_v42  ;;  %v880_v42 = vld [vmem:[%s1714_s2 + $0xa8] sm:$0xff] }
  0x3b   :  { %1133 = vmatprep.subr.mxu0 %v331_v43 }
  0x3c   :  { %1134 = vmatpush3.msra.mxu0 %v331_v43  ;;  %v879_v43 = vld [vmem:[%s1714_s2 + $0xa0] sm:$0xff] }
  0x3d   :  { %1135 = vmatprep.subr.mxu0 %v330_v60 }
  0x3e   :  { %1136 = vmatpush3.msra.mxu0 %v330_v60 }
  0x3f   :  { %1137 = vmatprep.subr.mxu0 %v329_v61 }
  0x40   :  { %1138 = vmatpush3.msra.mxu0 %v329_v61 }
  0x41   :  { %1139 = vmatprep.subr.mxu0 %v328_v62 }
  0x42   :  { %1140 = vmatpush3.msra.mxu0 %v328_v62 }
  0x43   :  { %1141 = vmatprep.subr.mxu0 %v327_v63 }
  0x44   :  { %1142 = vmatpush3.msra.mxu0 %v327_v63 }
  0x45   :  { %1183 = vmatprep.subr.mxu0 %v890_v32 }
  0xde   :  { %v1057_v44 = vpop.f32.mrf.mxu0 }
  0xdf   :  { %v184_v47 = vadd.f32 %v1057_v44, %v1396_v11  ;;  %v878_v44 = vld [vmem:[%s1714_s2 + $0x98] sm:$0xff] }
  0xe0   :  { %v144_v45 = vpop.f32.mrf.mxu0 }
  0xe1   :  { %v183_v46 = vadd.f32 %v144_v45, %v1406_v13 }
  0xe2   :  { %v1060_v48 = vpop.f32.mrf.mxu0 }
  0xe3   :  { %1099 = vmatprep.mubr.f32.mxu1 %v183_v46  ;;  %v186_v51 = vadd.f32 %v1060_v48, %v1376_v7 }
  0xe4   :  { %v154_v49 = vpop.f32.mrf.mxu0  ;;  %1100 = vmatmul.mubr.f32.vlgmr.msra.gmra.mxu1 %v184_v47 }
  0xe5   :  { %v185_v50 = vadd.f32 %v154_v49, %v1386_v9 }
  0xe6   :  { %v1063_v52 = vpop.f32.mrf.mxu0 }
  0xe7   :  { %1102 = vmatprep.mubr.f32.mxu1 %v185_v50  ;;  %v188_v55 = vadd.f32 %v1063_v52, %v1352_v2 }
  0xe8   :  { %v164_v53 = vpop.f32.mrf.mxu0  ;;  %1103 = vmatmul.mubr.f32.gmra.mxu1 %v186_v51  ;;  %v866_v51 = vld [vmem:[%s1717_s5] ss:$0 sm:$0xff] }
  0xe9   :  { %v187_v54 = vadd.f32 %v164_v53, %v1363_v4 }
  0xea   :  { %v1066_v56 = vpop.f32.mrf.mxu0 }
  0xeb   :  { %1105 = vmatprep.mubr.f32.mxu1 %v187_v54  ;;  %v190_v59 = vadd.f32 %v1066_v56, %v1340_v0  ;;  %v865_v0 = vld [vmem:[%s1715_s3] ss:$0 sm:$0xff] }
  0xec   :  { %v174_v57 = vpop.f32.mrf.mxu0  ;;  %1106 = vmatmul.mubr.f32.gmra.mxu1 %v188_v55 }
  0xed   :  { %v189_v58 = vadd.f32 %v174_v57, %v1345_v1 }
  0xef   :  { %1108 = vmatprep.mubr.f32.mxu1 %v189_v58 }
  0xf0   :  { %1109 = vmatmul.mubr.f32.gmra.mxu1 %v190_v59 }
  0xf1   :  { %1171 = vmatprep.mubr.msk.f32.mxu1 %vm53_vm0, %v1354_v3 }
 0x1a4   :  { %v1101_v1 = vpop.f32.mrf.mxu1 }
 0x1a5   :  { %v286_v2 = vadd.f32 %v1101_v1, %v865_v0 }
 0x1a6   :  { %v280_v3 = vpop.f32.mrf.mxu1 }
 0x1a7   :  { %v281_v4 = vadd.f32 %v865_v0, %v280_v3  ;;  %v320_v7 = vmax.f32 %v286_v2, 0.0 }
 0x1a8   :  { %v1104_v5 = vpop.f32.mrf.mxu1 }
 0x1a9   :  { %v319_v6 = vmax.f32 %v281_v4, 0.0  ;;  %v296_v8 = vadd.f32 %v1104_v5, %v865_v0 }
 0x1aa   :  { %v290_v9 = vpop.f32.mrf.mxu1 }
 0x1ab   :  { %v291_v10 = vadd.f32 %v865_v0, %v290_v9  ;;  %1143 = vmatprep.mubr.f32.mxu0 %v319_v6  ;;  %v322_v13 = vmax.f32 %v296_v8, 0.0  ;;  %v904_v6 = vld [vmem:[%s1716_s4 + $0xd8] sm:$0xff]  ;;  %v902_v8 = vld [vmem:[%s1716_s4 + $0xc8] sm:$0xff]  ;;  %v901_v9 = vld [vmem:[%s1716_s4 + $0xc0] sm:$0xff] }
 0x1ac   :  { %v1107_v11 = vpop.f32.mrf.mxu1  ;;  %1144 = vmatmul.mubr.f32.vlgmr.msra.gmra.mxu0 %v320_v7  ;;  %v903_v7 = vld [vmem:[%s1716_s4 + $0xd0] sm:$0xff] }
 0x1ad   :  { %v321_v12 = vmax.f32 %v291_v10, 0.0  ;;  %v306_v14 = vadd.f32 %v1107_v11, %v865_v0  ;;  %1184 = vmatpush3.msra.mxu0 %v890_v32  ;;  %v900_v10 = vld [vmem:[%s1716_s4 + $0xb8] sm:$0xff]  ;;  %v899_v11 = vld [vmem:[%s1716_s4 + $0xb0] sm:$0xff] }
 0x1ae   :  { %v300_v17 = vpop.f32.mrf.mxu1  ;;  %1185 = vmatprep.subr.mxu0 %v889_v33 }
 0x1af   :  { %v301_v18 = vadd.f32 %v865_v0, %v300_v17  ;;  %1146 = vmatprep.mubr.f32.mxu0 %v321_v12  ;;  %v324_v25 = vmax.f32 %v306_v14, 0.0  ;;  %1186 = vmatpush3.msra.mxu0 %v889_v33  ;;  %v898_v12 = vld [vmem:[%s1716_s4 + $0xa8] sm:$0xff] }
 0x1b0   :  { %v1110_v21 = vpop.f32.mrf.mxu1  ;;  %1147 = vmatmul.mubr.f32.gmra.mxu0 %v322_v13  ;;  %1187 = vmatprep.subr.mxu0 %v888_v34  ;;  %v897_v13 = vld [vmem:[%s1716_s4 + $0xa0] sm:$0xff] }
 0x1b1   :  { %v323_v22 = vmax.f32 %v301_v18, 0.0  ;;  %v316_v26 = vadd.f32 %v1110_v21, %v865_v0  ;;  %1188 = vmatpush3.msra.mxu0 %v888_v34 }
 0x1b2   :  { %v310_v28 = vpop.f32.mrf.mxu1  ;;  %1189 = vmatprep.subr.mxu0 %v887_v35 }
 0x1b3   :  { %v311_v29 = vadd.f32 %v865_v0, %v310_v28  ;;  %1149 = vmatprep.mubr.f32.mxu0 %v323_v22  ;;  %v326_v31 = vmax.f32 %v316_v26, 0.0  ;;  %1190 = vmatpush3.msra.mxu0 %v887_v35 }
 0x1b4   :  { %1150 = vmatmul.mubr.f32.gmra.mxu0 %v324_v25  ;;  %1191 = vmatprep.subr.mxu0 %v886_v36 }
 0x1b5   :  { %v325_v30 = vmax.f32 %v311_v29, 0.0  ;;  %1192 = vmatpush3.msra.mxu0 %v886_v36 }
 0x1b6   :  { %1193 = vmatprep.subr.mxu0 %v885_v37 }
 0x1b7   :  { %1152 = vmatprep.mubr.f32.mxu0 %v325_v30  ;;  %1194 = vmatpush3.msra.mxu0 %v885_v37  ;;  %v896_v37 = vld [vmem:[%s1716_s4 + $0x98] sm:$0xff] }
 0x1b8   :  { %1153 = vmatmul.mubr.f32.gmra.mxu0 %v326_v31  ;;  %1195 = vmatprep.subr.mxu0 %v884_v38 }
 0x1b9   :  { %1196 = vmatpush3.msra.mxu0 %v884_v38  ;;  %v895_v38 = vld [vmem:[%s1716_s4 + $0x90] sm:$0xff] }
 0x1ba   :  { %1197 = vmatprep.subr.mxu0 %v883_v39 }
 0x1bb   :  { %1198 = vmatpush3.msra.mxu0 %v883_v39  ;;  %v894_v39 = vld [vmem:[%s1716_s4 + $0x88] sm:$0xff] }
 0x1bc   :  { %1199 = vmatprep.subr.mxu0 %v882_v40 }
 0x1bd   :  { %1200 = vmatpush3.msra.mxu0 %v882_v40  ;;  %v893_v40 = vld [vmem:[%s1716_s4 + $0x80] sm:$0xff] }
 0x1be   :  { %1201 = vmatprep.subr.mxu0 %v881_v41 }
 0x1bf   :  { %1202 = vmatpush3.msra.mxu0 %v881_v41  ;;  %v892_v41 = vld [vmem:[%s1715_s3 + $0x1] ss:$0 sm:$0xff] }
 0x1c0   :  { %1203 = vmatprep.subr.mxu0 %v880_v42 }
 0x1c1   :  { %1204 = vmatpush3.msra.mxu0 %v880_v42 }
 0x1c2   :  { %1205 = vmatprep.subr.mxu0 %v879_v43 }
 0x1c3   :  { %1206 = vmatpush3.msra.mxu0 %v879_v43 }
 0x1c4   :  { %1207 = vmatprep.subr.mxu0 %v878_v44 }
 0x1c5   :  { %1208 = vmatpush3.msra.mxu0 %v878_v44 }
 0x26c   :  { %v1145_v45 = vpop.f32.mrf.mxu0 }
 0x26d   :  { %v422_v0 = vadd.f32 %v1145_v45, %v866_v51 }
 0x26e   :  { %v416_v46 = vpop.f32.mrf.mxu0 }
 0x26f   :  { %v417_v2 = vadd.f32 %v866_v51, %v416_v46  ;;  %v1598_v4 = vmax.f32 %v422_v0, 0.0 }
 0x270   :  { %v1148_v47 = vpop.f32.mrf.mxu0 }
 0x271   :  { %v432_v60 = vadd.f32 %v1148_v47, %v866_v51  ;;  %v455_v5 = vmax.f32 %v417_v2, 0.0  ;;  %v910_v2 = vld [vmem:[%s1717_s5 + $0x1] ss:$0 sm:$0xff] }
 0x272   :  { %v426_v48 = vpop.f32.mrf.mxu0 }
 0x273   :  { %v427_v62 = vadd.f32 %v866_v51, %v426_v48  ;;  %v1590_v1 = vmax.f32 %v432_v60, 0.0 }
 0x274   :  { %v1151_v49 = vpop.f32.mrf.mxu0 }
 0x275   :  { %v442_v55 = vadd.f32 %v1151_v49, %v866_v51  ;;  %v1594_v3 = vmax.f32 %v427_v62, 0.0 }
 0x276   :  { %v436_v50 = vpop.f32.mrf.mxu0 }
 0x277   :  { %v437_v58 = vadd.f32 %v866_v51, %v436_v50  ;;  %v1582_v61 = vmax.f32 %v442_v55, 0.0 }
 0x278   :  { %v1154_v52 = vpop.f32.mrf.mxu0 }
 0x279   :  { %v452_v53 = vadd.f32 %v1154_v52, %v866_v51  ;;  %v1586_v63 = vmax.f32 %v437_v58, 0.0 }
 0x27a   :  { %v446_v54 = vpop.f32.mrf.mxu0 }
 0x27b   :  { %v1576_v56 = vmax.f32 %v452_v53, 0.0  ;;  %v447_v57 = vadd.f32 %v866_v51, %v446_v54 }
 0x27d   :  { %v1578_v59 = vmax.f32 %v447_v57, 0.0  ;;  %1155 = vmatprep.subr.mxu1 %v1576_v56 }
 0x27e   :  { %1156 = vmatpush3.msra.mxu1 %v1576_v56 }
 0x27f   :  { %1157 = vmatprep.subr.mxu1 %v1578_v59 }
 0x280   :  { %1158 = vmatpush3.msra.mxu1 %v1578_v59 }
 0x281   :  { %1159 = vmatprep.subr.mxu1 %v1582_v61 }
 0x282   :  { %1160 = vmatpush3.msra.mxu1 %v1582_v61 }
 0x283   :  { %1161 = vmatprep.subr.mxu1 %v1586_v63 }
 0x284   :  { %1162 = vmatpush3.msra.mxu1 %v1586_v63 }
 0x285   :  { %1163 = vmatprep.subr.mxu1 %v1590_v1 }
 0x286   :  { %1164 = vmatpush3.msra.mxu1 %v1590_v1 }
 0x287   :  { %1165 = vmatprep.subr.mxu1 %v1594_v3 }
 0x288   :  { %1166 = vmatpush3.msra.mxu1 %v1594_v3 }
 0x289   :  { %1167 = vmatprep.subr.mxu1 %v1598_v4 }
 0x28a   :  { %1168 = vmatpush3.msra.mxu1 %v1598_v4 }
 0x28b   :  { %1169 = vmatprep.subr.mxu1 %v455_v5 }
 0x28c   :  { %1170 = vmatpush3.msra.mxu1 %v455_v5 }
 0x28d   :  { %1172 = vmatmul.mubr.msk.f32.vlgmr.msra.gmra.mxu1 %vm53_vm0, %v1413_v15  ;;  %v877_v15 = vld [vmem:[%s1714_s2 + $0x90] sm:$0xff] }
 0x28e   :  { %1174 = vmatprep.mubr.msk.f32.mxu1 %vm53_vm0, %v1416_v16  ;;  %1209 = vmatprep.subr.mxu0 %v877_v15  ;;  %v876_v16 = vld [vmem:[%s1714_s2 + $0x88] sm:$0xff] }
 0x28f   :  { %1210 = vmatpush3.msra.mxu0 %v877_v15 }
 0x290   :  { %1211 = vmatprep.subr.mxu0 %v876_v16 }
 0x291   :  { %1175 = vmatmul.mubr.msk.f32.gmra.mxu1 %vm53_vm0, %v1429_v19  ;;  %1212 = vmatpush3.msra.mxu0 %v876_v16  ;;  %v875_v19 = vld [vmem:[%s1714_s2 + $0x80] sm:$0xff] }
 0x292   :  { %1177 = vmatprep.mubr.msk.f32.mxu1 %vm53_vm0, %v1431_v20  ;;  %1213 = vmatprep.subr.mxu0 %v875_v19  ;;  %v908_v20 = vld [vmem:[%s1716_s4 + $0xf8] sm:$0xff] }
 0x293   :  { %1214 = vmatpush3.msra.mxu0 %v875_v19  ;;  %1227 = vmatprep.subr.mxu1 %v908_v20 }
 0x294   :  { %1228 = vmatpush3.msra.mxu1 %v908_v20 }
 0x295   :  { %1178 = vmatmul.mubr.msk.f32.gmra.mxu1 %vm53_vm0, %v1443_v23  ;;  %v907_v23 = vld [vmem:[%s1716_s4 + $0xf0] sm:$0xff] }
 0x296   :  { %1180 = vmatprep.mubr.msk.f32.mxu1 %vm53_vm0, %v1445_v24  ;;  %v906_v24 = vld [vmem:[%s1716_s4 + $0xe8] sm:$0xff]  ;;  %1229 = vmatprep.subr.mxu1 %v907_v23 }
 0x297   :  { %1230 = vmatpush3.msra.mxu1 %v907_v23 }
 0x298   :  { %1231 = vmatprep.subr.mxu1 %v906_v24 }
 0x299   :  { %1181 = vmatmul.mubr.msk.f32.gmra.mxu1 %vm53_vm0, %v1457_v27  ;;  %v905_v27 = vld [vmem:[%s1716_s4 + $0xe0] sm:$0xff] }
 0x29a   :  { %1232 = vmatpush3.msra.mxu1 %v906_v24 }
 0x29b   :  { %1233 = vmatprep.subr.mxu1 %v905_v27 }
 0x29c   :  { %1234 = vmatpush3.msra.mxu1 %v905_v27 }
 0x29d   :  { %1235 = vmatprep.subr.mxu1 %v904_v6 }
 0x29e   :  { %1236 = vmatpush3.msra.mxu1 %v904_v6 }
 0x29f   :  { %1237 = vmatprep.subr.mxu1 %v903_v7 }
 0x2a0   :  { %1238 = vmatpush3.msra.mxu1 %v903_v7 }
 0x2a1   :  { %1239 = vmatprep.subr.mxu1 %v902_v8 }
 0x2a2   :  { %1240 = vmatpush3.msra.mxu1 %v902_v8 }
 0x2a3   :  { %1241 = vmatprep.subr.mxu1 %v901_v9 }
 0x2a4   :  { %1242 = vmatpush3.msra.mxu1 %v901_v9 }
 0x2a5   :  { %1243 = vmatprep.subr.mxu1 %v900_v10 }
 0x2a6   :  { %1244 = vmatpush3.msra.mxu1 %v900_v10 }
 0x2a7   :  { %1245 = vmatprep.subr.mxu1 %v899_v11 }
 0x2a8   :  { %1246 = vmatpush3.msra.mxu1 %v899_v11 }
 0x2a9   :  { %1247 = vmatprep.subr.mxu1 %v898_v12 }
 0x2aa   :  { %1248 = vmatpush3.msra.mxu1 %v898_v12 }
 0x2ab   :  { %1249 = vmatprep.subr.mxu1 %v897_v13 }
 0x2ac   :  { %1250 = vmatpush3.msra.mxu1 %v897_v13 }
 0x2ad   :  { %1251 = vmatprep.subr.mxu1 %v896_v37 }
 0x2ae   :  { %1252 = vmatpush3.msra.mxu1 %v896_v37 }
 0x2af   :  { %1253 = vmatprep.subr.mxu1 %v895_v38 }
 0x2b0   :  { %1254 = vmatpush3.msra.mxu1 %v895_v38 }
 0x2b1   :  { %1255 = vmatprep.subr.mxu1 %v894_v39 }
 0x2b2   :  { %1256 = vmatpush3.msra.mxu1 %v894_v39 }
 0x2b3   :  { %1257 = vmatprep.subr.mxu1 %v893_v40 }
 0x2b4   :  { %1258 = vmatpush3.msra.mxu1 %v893_v40 }
 0x34d   :  { %v1173_v14 = vpop.f32.mrf.mxu1 }
 0x34e   :  { %v569_v21 = vadd.f32 %v1173_v14, %v1598_v4 }
 0x34f   :  { %v529_v17 = vpop.f32.mrf.mxu1 }
 0x350   :  { %v568_v18 = vadd.f32 %v529_v17, %v455_v5 }
 0x351   :  { %v1176_v22 = vpop.f32.mrf.mxu1 }
 0x352   :  { %1215 = vmatprep.mubr.f32.mxu0 %v568_v18  ;;  %v571_v28 = vadd.f32 %v1176_v22, %v1590_v1 }
 0x353   :  { %v539_v25 = vpop.f32.mrf.mxu1  ;;  %1216 = vmatmul.mubr.f32.vlgmr.msra.gmra.mxu0 %v569_v21 }
 0x354   :  { %v570_v26 = vadd.f32 %v539_v25, %v1594_v3 }
 0x355   :  { %v1179_v29 = vpop.f32.mrf.mxu1 }
 0x356   :  { %1218 = vmatprep.mubr.f32.mxu0 %v570_v26  ;;  %v573_v32 = vadd.f32 %v1179_v29, %v1582_v61 }
 0x357   :  { %v549_v30 = vpop.f32.mrf.mxu1  ;;  %1219 = vmatmul.mubr.f32.gmra.mxu0 %v571_v28 }
 0x358   :  { %v572_v31 = vadd.f32 %v549_v30, %v1586_v63 }
 0x359   :  { %v1182_v33 = vpop.f32.mrf.mxu1 }
 0x35a   :  { %1221 = vmatprep.mubr.f32.mxu0 %v572_v31  ;;  %v575_v36 = vadd.f32 %v1182_v33, %v1576_v56 }
 0x35b   :  { %v559_v34 = vpop.f32.mrf.mxu1  ;;  %1222 = vmatmul.mubr.f32.gmra.mxu0 %v573_v32 }
 0x35c   :  { %v574_v35 = vadd.f32 %v559_v34, %v1578_v59 }
 0x35e   :  { %1224 = vmatprep.mubr.f32.mxu0 %v574_v35 }
 0x35f   :  { %1225 = vmatmul.mubr.f32.gmra.mxu0 %v575_v36 }
 0x413   :  { %v1217_v42 = vpop.f32.mrf.mxu0 }
 0x414   :  { %v673_v43 = vadd.f32 %v1217_v42, %v892_v41 }
 0x415   :  { %v667_v44 = vpop.f32.mrf.mxu0 }
 0x416   :  { %v668_v45 = vadd.f32 %v892_v41, %v667_v44  ;;  %v707_v48 = vmax.f32 %v673_v43, 0.0 }
 0x417   :  { %v1220_v46 = vpop.f32.mrf.mxu0 }
 0x418   :  { %v706_v47 = vmax.f32 %v668_v45, 0.0  ;;  %v683_v49 = vadd.f32 %v1220_v46, %v892_v41 }
 0x419   :  { %v677_v50 = vpop.f32.mrf.mxu0 }
 0x41a   :  { %v678_v51 = vadd.f32 %v892_v41, %v677_v50  ;;  %1259 = vmatprep.mubr.f32.mxu1 %v706_v47  ;;  %v709_v54 = vmax.f32 %v683_v49, 0.0 }
 0x41b   :  { %v1223_v52 = vpop.f32.mrf.mxu0  ;;  %1260 = vmatmul.mubr.f32.vlgmr.msra.gmra.mxu1 %v707_v48 }
 0x41c   :  { %v708_v53 = vmax.f32 %v678_v51, 0.0  ;;  %v693_v55 = vadd.f32 %v1223_v52, %v892_v41 }
 0x41d   :  { %v687_v56 = vpop.f32.mrf.mxu0 }
 0x41e   :  { %v688_v57 = vadd.f32 %v892_v41, %v687_v56  ;;  %1262 = vmatprep.mubr.f32.mxu1 %v708_v53  ;;  %v711_v60 = vmax.f32 %v693_v55, 0.0 }
 0x41f   :  { %v1226_v58 = vpop.f32.mrf.mxu0  ;;  %1263 = vmatmul.mubr.f32.gmra.mxu1 %v709_v54 }
 0x420   :  { %v710_v59 = vmax.f32 %v688_v57, 0.0  ;;  %v703_v61 = vadd.f32 %v1226_v58, %v892_v41 }
 0x421   :  { %v697_v62 = vpop.f32.mrf.mxu0 }
 0x422   :  { %v698_v63 = vadd.f32 %v892_v41, %v697_v62  ;;  %1265 = vmatprep.mubr.f32.mxu1 %v710_v59  ;;  %v713_v1 = vmax.f32 %v703_v61, 0.0 }
 0x423   :  { %1266 = vmatmul.mubr.f32.gmra.mxu1 %v711_v60 }
 0x424   :  { %v712_v0 = vmax.f32 %v698_v63, 0.0 }
 0x426   :  { %1268 = vmatprep.mubr.f32.mxu1 %v712_v0 }
 0x427   :  { %1269 = vmatmul.mubr.f32.gmra.mxu1 %v713_v1 }
 0x4db   :  { %v1261_v3 = vpop.f32.mrf.mxu1 }
 0x4dc   :  { %v811_v4 = vadd.f32 %v1261_v3, %v910_v2 }
 0x4dd   :  { %v805_v5 = vpop.f32.mrf.mxu1 }
 0x4de   :  { %845 = vst [vmem:[%s1718_s6 + $0x8] sm:$0xff] %v811_v4  ;;  %v806_v15 = vadd.f32 %v910_v2, %v805_v5 }
 0x4df   :  { %v1264_v16 = vpop.f32.mrf.mxu1 }
 0x4e0   :  { %844 = vst [vmem:[%s1718_s6] sm:$0xff] %v806_v15  ;;  %v821_v19 = vadd.f32 %v1264_v16, %v910_v2 }
 0x4e1   :  { %v815_v20 = vpop.f32.mrf.mxu1 }
 0x4e2   :  { %847 = vst [vmem:[%s1718_s6 + $0x18] sm:$0xff] %v821_v19  ;;  %v816_v23 = vadd.f32 %v910_v2, %v815_v20 }
 0x4e3   :  { %v1267_v24 = vpop.f32.mrf.mxu1 }
 0x4e4   :  { %846 = vst [vmem:[%s1718_s6 + $0x10] sm:$0xff] %v816_v23  ;;  %v831_v27 = vadd.f32 %v1267_v24, %v910_v2 }
 0x4e5   :  { %v825_v6 = vpop.f32.mrf.mxu1 }
 0x4e6   :  { %849 = vst [vmem:[%s1718_s6 + $0x28] sm:$0xff] %v831_v27  ;;  %v826_v7 = vadd.f32 %v910_v2, %v825_v6 }
 0x4e7   :  { %v1270_v8 = vpop.f32.mrf.mxu1 }
 0x4e8   :  { %848 = vst [vmem:[%s1718_s6 + $0x20] sm:$0xff] %v826_v7  ;;  %v841_v9 = vadd.f32 %v1270_v8, %v910_v2 }
 0x4e9   :  { %v835_v10 = vpop.f32.mrf.mxu1 }
 0x4ea   :  { %851 = vst [vmem:[%s1718_s6 + $0x38] sm:$0xff] %v841_v9  ;;  %v836_v11 = vadd.f32 %v910_v2, %v835_v10 }
 0x4ec   :  { %850 = vst [vmem:[%s1718_s6 + $0x30] sm:$0xff] %v836_v11 }
 0x4ed   :  { %856 = vsyncpa [#allocation3], 1 }

</bundles_post_ra>
